<compile_context>
chip_gen: v5e
topology: v5e:2x2
jax: 0.10.0
libtpu: 0.0.40
codegen_flags: <defaults>
</compile_context>

<pallas_src>
import jax
import jax.numpy as jnp
from jax import lax
from jax.experimental import pallas as pl
from jax.experimental.pallas import tpu as pltpu

_LANE = 128
_TARGET_STEP_BYTES = 8 * 1024 * 1024    # operand bytes streamed per grid step
_VMEM_BLOCK_BUDGET = 28 * 1024 * 1024   # double-buffered blocks + f32 temps
_VMEM_LIMIT_BYTES = 40 * 1024 * 1024    # well under v7x's 64 MiB physical VMEM
_MIN_TILES = 4                          # give v7x's 2 TensorCores work to split


def _round_up(v, m):
    return -(-v // m) * m


def _round_down(v, m):
    return (v // m) * m


def _make_sse_kernel(n_inputs, tile_rows, valid_rows, ragged):
    """Builds kernel(t_ref, x0_ref, ..., x{n-1}_ref, o_ref)."""

    def kernel(*refs):
        t_ref = refs[0]
        x_refs = refs[1:1 + n_inputs]
        o_ref = refs[1 + n_inputs]

        t = t_ref[...].astype(jnp.float32)

        if ragged:
            # (tr, 1) compare; all-True except on the (partially OOB) last tile.
            rem = valid_rows - pl.program_id(0) * tile_rows
            row_iota = lax.broadcasted_iota(jnp.int32, (tile_rows, 1), 0)
            mask = row_iota < rem

        # Reduce each input's squared diff to a (1, 128) lane-sum right away;
        # accumulate only the tiny partials (no full-tile accumulator).
        acc = jnp.zeros((1, _LANE), jnp.float32)
        for x_ref in x_refs:
            d = x_ref[...].astype(jnp.float32) - t
            sq = d * d
            if ragged:
                sq = jnp.where(mask, sq, 0.0)
            acc = acc + jnp.sum(sq, axis=0, keepdims=True)

        o_ref[0] = acc                                  # (1, 128) lane-dense

    return kernel


def mse_loss_greedy(inputs, target, *, max_tile_rows=None):
    """sum_i mse_loss(inputs[i], target) with mean reduction (PyTorch default)."""
    inputs = list(inputs)
    n = len(inputs)
    assert n >= 1
    m = target.size                       # true element count (MSE denominator)

    rows = m // _LANE
    tail = m % _LANE

    t_flat = jnp.ravel(target)            # free reshape for contiguous arrays
    x_flats = [jnp.ravel(x) for x in inputs]

    sse = jnp.float32(0.0)

    if rows > 0:
        # Aligned prefix only (no jnp.pad HBM copies); tail handled below.
        t2 = t_flat[:rows * _LANE].reshape(rows, _LANE)
        xs = [xf[:rows * _LANE].reshape(rows, _LANE) for xf in x_flats]

        # Dtype-aware sizing: sub-32-bit inputs pack along sublanes.
        itemsizes = [jnp.dtype(a.dtype).itemsize for a in [target] + inputs]
        row_mult = max(8, (32 // (min(itemsizes) * 8)) * 8)   # 8 / 16 / 32
        per_row_stream = sum(_LANE * s for s in itemsizes)    # HBM bytes / row
        per_row_vmem = 2 * per_row_stream + 3 * _LANE * 4     # 2-buf + f32 temps

        tr = min(_TARGET_STEP_BYTES // per_row_stream,
                 _VMEM_BLOCK_BUDGET // per_row_vmem)
        if max_tile_rows is not None:                         # testing override
            tr = min(tr, max_tile_rows)
        if rows >= _MIN_TILES * row_mult:
            # Keep >= _MIN_TILES tiles so the parallel axis feeds both v7x TCs.
            tr = min(tr, _round_up(pl.cdiv(rows, _MIN_TILES), row_mult))
        tr = max(row_mult, _round_down(tr, row_mult))
        if tr >= rows:
            tr = rows                     # single full-extent block (always legal)

        num_tiles = pl.cdiv(rows, tr)
        ragged = (rows % tr) != 0

        kernel = _make_sse_kernel(n, tr, rows, ragged)
        data_spec = pl.BlockSpec((tr, _LANE), lambda r: (r, 0))

        partials = pl.pallas_call(
            kernel,
            out_shape=jax.ShapeDtypeStruct((num_tiles, 1, _LANE), jnp.float32),
            grid=(num_tiles,),
            in_specs=[data_spec] * (n + 1),
            out_specs=pl.BlockSpec((1, 1, _LANE), lambda r: (r, 0, 0)),
            compiler_params=pltpu.CompilerParams(
                dimension_semantics=("parallel",),
                vmem_limit_bytes=_VMEM_LIMIT_BYTES),
        )(t2, *xs)

        sse = sse + jnp.sum(partials)

    if tail:
        # <128-element remainder (and the whole array when m < 128): tiny jnp.
        t_tail = t_flat[rows * _LANE:].astype(jnp.float32)
        for xf in x_flats:
            d = xf[rows * _LANE:].astype(jnp.float32) - t_tail
            sse = sse + jnp.sum(d * d)

    return sse / jnp.float32(m)


if __name__ == "__main__":
    key = jax.random.PRNGKey(0)
    k0, k1, k2, kt, k3, k4, k5 = jax.random.split(key, 7)

    # Case 1: NCHW-like shape from the module spec (single full-extent block).
    shape = (2, 4, 16, 16)
    inputs = [
        jax.random.normal(k0, shape, dtype=jnp.float32),
        jax.random.normal(k1, shape, dtype=jnp.float32),
        jax.random.normal(k2, shape, dtype=jnp.float32),
    ]
    target = jax.random.normal(kt, shape, dtype=jnp.float32)
    out = jax.block_until_ready(mse_loss_greedy(inputs, target))
    ref = sum(jnp.mean((x - target) ** 2) for x in inputs)
    assert jnp.allclose(out, ref, rtol=1e-5, atol=1e-5), (out, ref)

    # Case 2: multi-tile grid + ragged-last-tile mask path (forced small tiles).
    shape2 = (2, 4, 17, 16)                          # 2176 elems -> 17 rows
    inputs2 = [jax.random.normal(k3, shape2, dtype=jnp.float32),
               jax.random.normal(k4, shape2, dtype=jnp.float32)]
    target2 = jax.random.normal(k5, shape2, dtype=jnp.float32)
    out2 = jax.block_until_ready(
        mse_loss_greedy(inputs2, target2, max_tile_rows=8))
    ref2 = sum(jnp.mean((x - target2) ** 2) for x in inputs2)
    assert jnp.allclose(out2, ref2, rtol=1e-5, atol=1e-5), (out2, ref2)

    # Case 3: element count not a multiple of 128 -> kernel prefix + jnp tail.
    shape3 = (3, 5, 97)                              # 1455 elems: 11 rows + 47
    inputs3 = [jax.random.normal(k0, shape3, dtype=jnp.float32),
               jax.random.normal(k1, shape3, dtype=jnp.float32)]
    target3 = jax.random.normal(k2, shape3, dtype=jnp.float32)
    out3 = jax.block_until_ready(mse_loss_greedy(inputs3, target3))
    ref3 = sum(jnp.mean((x - target3) ** 2) for x in inputs3)
    assert jnp.allclose(out3, ref3, rtol=1e-5, atol=1e-5), (out3, ref3)

    # Case 4: fewer than 128 elements total (pure wrapper tail path).
    shape4 = (3, 5, 7)                               # 105 elements
    inputs4 = [jax.random.normal(k3, shape4, dtype=jnp.float32)]
    target4 = jax.random.normal(k4, shape4, dtype=jnp.float32)
    out4 = jax.block_until_ready(mse_loss_greedy(inputs4, target4))
    ref4 = jnp.mean((inputs4[0] - target4) ** 2)
    assert jnp.allclose(out4, ref4, rtol=1e-5, atol=1e-5), (out4, ref4)

    # Case 5: bf16 inputs (dtype-aware tiling, in-kernel upcast to f32).
    inputs5 = [jax.random.normal(k0, shape, dtype=jnp.bfloat16),
               jax.random.normal(k1, shape, dtype=jnp.bfloat16)]
    target5 = jax.random.normal(k2, shape, dtype=jnp.bfloat16)
    out5 = jax.block_until_ready(mse_loss_greedy(inputs5, target5))
    t5 = target5.astype(jnp.float32)
    ref5 = sum(jnp.mean((x.astype(jnp.float32) - t5) ** 2) for x in inputs5)
    assert jnp.allclose(out5, ref5, rtol=1e-5, atol=1e-5), (out5, ref5)

    print("KERNEL_OK")
</pallas_src>

<mosaic_0001>
module attributes {stable_mosaic.version = 11 : i64} {
  func.func @kernel(%arg0: i32, %arg1: memref<16x128xf32, #tpu.memory_space<vmem>>, %arg2: memref<16x128xf32, #tpu.memory_space<vmem>>, %arg3: memref<16x128xf32, #tpu.memory_space<vmem>>, %arg4: memref<16x128xf32, #tpu.memory_space<vmem>>, %arg5: memref<1x1x128xf32, #tpu.memory_space<vmem>>) attributes {dimension_semantics = [#tpu.dimension_semantics<parallel>], iteration_bounds = array<i64: 1>, scalar_prefetch = 0 : i64, scratch_operands = 0 : i64, tpu.core_type = #tpu.core_type<tc>, window_params = [{transform_indices = @transform_0, window_bounds = array<i64: 16, 128>}, {transform_indices = @transform_1, window_bounds = array<i64: 16, 128>}, {transform_indices = @transform_2, window_bounds = array<i64: 16, 128>}, {transform_indices = @transform_3, window_bounds = array<i64: 16, 128>}, {transform_indices = @transform_4, window_bounds = array<i64: 1, 1, 128>}]} {
    %c0 = arith.constant 0 : index
    %c0_0 = arith.constant 0 : index
    %0 = vector.load %arg1[%c0, %c0_0] : memref<16x128xf32, #tpu.memory_space<vmem>>, vector<16x128xf32>
    %cst = arith.constant 0.000000e+00 : f32
    %1 = vector.broadcast %cst : f32 to vector<1x128xf32>
    %c0_1 = arith.constant 0 : index
    %c0_2 = arith.constant 0 : index
    %2 = vector.load %arg2[%c0_1, %c0_2] : memref<16x128xf32, #tpu.memory_space<vmem>>, vector<16x128xf32>
    %3 = arith.subf %2, %0 : vector<16x128xf32>
    %4 = arith.mulf %3, %3 : vector<16x128xf32>
    %cst_3 = arith.constant dense<0.000000e+00> : vector<128xf32>
    %5 = vector.multi_reduction <add>, %4, %cst_3 [0] : vector<16x128xf32> to vector<128xf32>
    %6 = vector.shape_cast %5 : vector<128xf32> to vector<1x128xf32>
    %7 = arith.addf %1, %6 : vector<1x128xf32>
    %c0_4 = arith.constant 0 : index
    %c0_5 = arith.constant 0 : index
    %8 = vector.load %arg3[%c0_4, %c0_5] : memref<16x128xf32, #tpu.memory_space<vmem>>, vector<16x128xf32>
    %9 = arith.subf %8, %0 : vector<16x128xf32>
    %10 = arith.mulf %9, %9 : vector<16x128xf32>
    %cst_6 = arith.constant dense<0.000000e+00> : vector<128xf32>
    %11 = vector.multi_reduction <add>, %10, %cst_6 [0] : vector<16x128xf32> to vector<128xf32>
    %12 = vector.shape_cast %11 : vector<128xf32> to vector<1x128xf32>
    %13 = arith.addf %7, %12 : vector<1x128xf32>
    %c0_7 = arith.constant 0 : index
    %c0_8 = arith.constant 0 : index
    %14 = vector.load %arg4[%c0_7, %c0_8] : memref<16x128xf32, #tpu.memory_space<vmem>>, vector<16x128xf32>
    %15 = arith.subf %14, %0 : vector<16x128xf32>
    %16 = arith.mulf %15, %15 : vector<16x128xf32>
    %cst_9 = arith.constant dense<0.000000e+00> : vector<128xf32>
    %17 = vector.multi_reduction <add>, %16, %cst_9 [0] : vector<16x128xf32> to vector<128xf32>
    %18 = vector.shape_cast %17 : vector<128xf32> to vector<1x128xf32>
    %19 = arith.addf %13, %18 : vector<1x128xf32>
    %c0_10 = arith.constant 0 : index
    %c0_11 = arith.constant 0 : index
    %c0_12 = arith.constant 0 : index
    %20 = vector.load %arg5[%c0_10, %c0_11, %c0_12] : memref<1x1x128xf32, #tpu.memory_space<vmem>>, vector<1x1x128xf32>
    %21 = vector.shape_cast %20 : vector<1x1x128xf32> to vector<1x128xf32>
    %22 = vector.shape_cast %19 : vector<1x128xf32> to vector<1x1x128xf32>
    tpu.vector_store %arg5[%c0_10, %c0_11, %c0_12], %22 {strides = array<i32>} : memref<1x1x128xf32, #tpu.memory_space<vmem>>, vector<1x1x128xf32>,
    return
  }
  func.func @transform_0(%arg0: i32) -> (i32, i32) {
    %c0_i32 = arith.constant 0 : i32
    %c0_i32_0 = arith.constant 0 : i32
    return %arg0, %c0_i32 : i32, i32
  }
  func.func @transform_1(%arg0: i32) -> (i32, i32) {
    %c0_i32 = arith.constant 0 : i32
    %c0_i32_0 = arith.constant 0 : i32
    return %arg0, %c0_i32 : i32, i32
  }
  func.func @transform_2(%arg0: i32) -> (i32, i32) {
    %c0_i32 = arith.constant 0 : i32
    %c0_i32_0 = arith.constant 0 : i32
    return %arg0, %c0_i32 : i32, i32
  }
  func.func @transform_3(%arg0: i32) -> (i32, i32) {
    %c0_i32 = arith.constant 0 : i32
    %c0_i32_0 = arith.constant 0 : i32
    return %arg0, %c0_i32 : i32, i32
  }
  func.func @transform_4(%arg0: i32) -> (i32, i32, i32) {
    %c0_i32 = arith.constant 0 : i32
    %c0_i32_0 = arith.constant 0 : i32
    %c0_i32_1 = arith.constant 0 : i32
    return %arg0, %c0_i32, %c0_i32_0 : i32, i32, i32
  }
}

</mosaic_0001>

<bundles_post_ra>
// kernel: tpu_custom_call.1
= control target key start
LH: loop header
LB: loop body
LE: loop exit
PB: predicated region body
PF: predicated region fallthrough
CT: control target
= control target key end

     0   :  { %9 = vsyncpa [#allocation3], 0  ;;  %s327_s0 = inlined_call_operand.hbm [shape: f32[16,128], index: 0, kind: input, shape index: {}]   ;;  %s328_s1 = inlined_call_operand.hbm [shape: f32[16,128], index: 1, kind: input, shape index: {}]   ;;  %s329_s2 = inlined_call_operand.hbm [shape: f32[16,128], index: 2, kind: input, shape index: {}]   ;;  %s330_s3 = inlined_call_operand.hbm [shape: f32[16,128], index: 3, kind: input, shape index: {}]   ;;  %s331_s4 = inlined_call_operand.hbm [shape: f32[1,1,128], index: 4, kind: output, shape index: {}]  }
   0x1   :  { %10 = vsyncpa [#allocation6], 0 }
   0x2   :  { %11 = vsyncpa [#allocation9], 0 }
   0x3   :  { %12 = vsyncpa [#allocation4], 0  ;;  %s30_s17 = sshll.u32 %s328_s1, 4  ;;  %s280_s18 = smov [#allocation5]   ;;  %s31_s17 = int_to_ptr.hbm [resolvable:$true] %s30_s17 }
   0x4   :  { %s32_s19 = sshll.u32 %s280_s18, 4  ;;  %s17_s22 = sshll.u32 %s327_s0, 4  ;;  %s33_s19 = int_to_ptr.vmem [resolvable:$true] %s32_s19  ;;  %s18_s22 = int_to_ptr.hbm [resolvable:$true] %s17_s22 }
   0x5   :  { %s281_s23 = smov 128   ;;  %s282_s24 = smov 8  }
   0x6   :  { %38 = dma.hbm_to_vmem [thread:$0]  %s31_s17, 256, %s33_s19, [#allocation6], %s281_s23, %s281_s23, %s282_s24  }
   0x7   :  { %s283_s25 = smov [#allocation2]   ;;  %s43_s29 = sshll.u32 %s329_s2, 4  ;;  %s44_s29 = int_to_ptr.hbm [resolvable:$true] %s43_s29 }
   0x8   :  { %s19_s26 = sshll.u32 %s283_s25, 4  ;;  %s56_s5 = sshll.u32 %s330_s3, 4  ;;  %s20_s26 = int_to_ptr.vmem [resolvable:$true] %s19_s26  ;;  %s57_s5 = int_to_ptr.hbm [resolvable:$true] %s56_s5 }
   0x9   :  { %25 = dma.hbm_to_vmem [thread:$0]  %s18_s22, 256, %s20_s26, [#allocation3], %s281_s23, %s281_s23, %s282_s24  }
   0xa   :  { %s284_s6 = smov [#allocation7]   ;;  %s285_s0 = smov [#allocation8]  }
   0xb   :  { %s45_s7 = sshll.u32 %s284_s6, 4  ;;  %s58_s8 = sshll.u32 %s285_s0, 4  ;;  %s46_s7 = int_to_ptr.vmem [resolvable:$true] %s45_s7  ;;  %s59_s8 = int_to_ptr.vmem [resolvable:$true] %s58_s8 }
   0xc   :  { %51 = dma.hbm_to_vmem [thread:$0]  %s44_s29, 256, %s46_s7, [#allocation6], %s281_s23, %s281_s23, %s282_s24  }
   0xd   :  { %64 = dma.hbm_to_vmem [thread:$0]  %s57_s5, 256, %s59_s8, [#allocation9], %s281_s23, %s281_s23, %s282_s24  }
   0xe   :  { %272 = dma.done.wait [#allocation3], 256  }
   0xf   :  { %273 = vsyncadd [#allocation3], 4294967040 }
  0x10   :  { %274 = dma.done.wait [#allocation6], 512  }
  0x11   :  { %275 = vsyncadd [#allocation6], 4294966784 }
  0x12   :  { %276 = dma.done.wait [#allocation9], 256  }
  0x13   :  { %277 = vsyncadd [#allocation9], 4294967040  ;;  %v81_v0 = vld [vmem:[#allocation2] sm:$0xff]  ;;  %v82_v1 = vld [vmem:[#allocation2 + $0x8] sm:$0xff]  ;;  %s286_s2 = smov [#allocation10]   ;;  %s133_s11 = sshll.u32 %s331_s4, 4  ;;  %s134_s11 = int_to_ptr.hbm [resolvable:$true] %s133_s11 }
  0x14   :  { %v83_v2 = vld [vmem:[#allocation5] sm:$0xff]  ;;  %v84_v3 = vld [vmem:[#allocation5 + $0x8] sm:$0xff]  ;;  %v97_v5 = vld [vmem:[#allocation7] sm:$0xff]  ;;  %s131_s3 = sshll.u32 %s286_s2, 4  ;;  %s132_s3 = int_to_ptr.vmem [resolvable:$true] %s131_s3 }
  0x15   :  { %v85_v4 = vsub.f32 %v83_v2, %v81_v0  ;;  %v98_v6 = vld [vmem:[#allocation7 + $0x8] sm:$0xff]  ;;  %v86_v7 = vsub.f32 %v84_v3, %v82_v1  ;;  %v99_v8 = vsub.f32 %v97_v5, %v81_v0  ;;  %v111_v10 = vld [vmem:[#allocation8] sm:$0xff]  ;;  %v112_v11 = vld [vmem:[#allocation8 + $0x8] sm:$0xff] }
  0x16   :  { %v100_v9 = vsub.f32 %v98_v6, %v82_v1  ;;  %v113_v13 = vsub.f32 %v111_v10, %v81_v0  ;;  %v114_v14 = vsub.f32 %v112_v11, %v82_v1 }
  0x17   :  { %v87_v12 = vmul.f32 %v85_v4, %v85_v4  ;;  %v88_v15 = vmul.f32 %v86_v7, %v86_v7  ;;  %v101_v16 = vmul.f32 %v99_v8, %v99_v8 }
  0x18   :  { %v102_v17 = vmul.f32 %v100_v9, %v100_v9  ;;  %v115_v18 = vmul.f32 %v113_v13, %v113_v13  ;;  %v116_v19 = vmul.f32 %v114_v14, %v114_v14 }
  0x19   :  { %v89_v20 = vadd.f32 %v88_v15, %v87_v12 }
  0x1a   :  { %v103_v21 = vadd.f32 %v102_v17, %v101_v16  ;;  %v117_v22 = vadd.f32 %v116_v19, %v115_v18 }
  0x1b   :  { %v90_v23 = vrot.slane %v89_v20, 4 }
  0x1c   :  { %v104_v24 = vrot.slane %v103_v21, 4  ;;  %v118_v25 = vrot.slane %v117_v22, 4 }
  0x1d   :  { %v91_v26 = vadd.f32 %v90_v23, %v89_v20 }
  0x1e   :  { %v105_v27 = vadd.f32 %v104_v24, %v103_v21  ;;  %v119_v28 = vadd.f32 %v118_v25, %v117_v22 }
  0x1f   :  { %v92_v29 = vrot.slane %v91_v26, 2 }
  0x20   :  { %v106_v30 = vrot.slane %v105_v27, 2  ;;  %v120_v31 = vrot.slane %v119_v28, 2 }
  0x21   :  { %v93_v32 = vadd.f32 %v92_v29, %v91_v26 }
  0x22   :  { %v107_v33 = vadd.f32 %v106_v30, %v105_v27  ;;  %v121_v34 = vadd.f32 %v120_v31, %v119_v28 }
  0x23   :  { %v94_v35 = vrot.slane %v93_v32, 1 }
  0x24   :  { %v108_v36 = vrot.slane %v107_v33, 1  ;;  %v122_v37 = vrot.slane %v121_v34, 1 }
  0x25   :  { %v95_v38 = vadd.f32 %v94_v35, %v93_v32 }
  0x26   :  { %v109_v39 = vadd.f32 %v108_v36, %v107_v33  ;;  %v123_v40 = vadd.f32 %v122_v37, %v121_v34 }
  0x28   :  { %v110_v41 = vadd.f32 %v109_v39, %v95_v38 }
  0x2a   :  { %v124_v42 = vadd.f32 %v123_v40, %v110_v41 }
  0x2c   :  { %125 = vst [vmem:[#allocation10] sm:$0x1] %v124_v42 }
  0x2d   :  { %136 = dma.vmem_to_hbm [thread:$0]  %s132_s3, 16, %s134_s11, [#allocation4]  }
  0x2e   :  { %278 = dma.done.wait [#allocation4], 16  }
  0x2f   :  { %279 = vsyncadd [#allocation4], 4294967280 }
  0x30   :  { %141 = vsyncpa [#allocation3], 1 }
  0x31   :  { %142 = vsyncpa [#allocation6], 1 }
  0x32   :  { %143 = vsyncpa [#allocation9], 1 }
  0x33   :  { %144 = vsyncpa [#allocation4], 1 }

</bundles_post_ra>
